<compile_context>
chip_gen: v7x
topology: tpu7x:2x2x1
jax: 0.10.0
libtpu: 0.0.40
codegen_flags: <defaults>
</compile_context>

<pallas_src>
import functools

import jax
import jax.numpy as jnp
from jax.experimental import pallas as pl
from jax.experimental.pallas import tpu as pltpu


# ------------------------------- im2col glue ------------------------------- #
def _unfold_nchw(x, kernel_size, stride, padding, dilation):
    """torch.nn.functional.unfold for NCHW input.

    Returns cols of shape (B, K, L) with K = C_in*kH*kW in torch ordering
    (channel-major, then kernel row, then kernel col) and L = H_out*W_out on
    the LAST axis (the lane axis for the Pallas kernel).
    """
    kh, kw = kernel_size
    sh, sw = stride
    ph, pw = padding
    dh, dw = dilation
    B, C, H, W = x.shape
    Ho = (H + 2 * ph - dh * (kh - 1) - 1) // sh + 1
    Wo = (W + 2 * pw - dw * (kw - 1) - 1) // sw + 1
    xp = jnp.pad(x, ((0, 0), (0, 0), (ph, ph), (pw, pw)))
    patches = []
    for i in range(kh):
        for j in range(kw):
            sl = xp[:, :,
                    i * dh: i * dh + sh * (Ho - 1) + 1: sh,
                    j * dw: j * dw + sw * (Wo - 1) + 1: sw]   # (B, C, Ho, Wo)
            patches.append(sl)
    p = jnp.stack(patches, axis=2)                 # (B, C, kh*kw, Ho, Wo)
    cols = p.reshape(B, C * kh * kw, Ho * Wo)      # (B, K, L)
    return cols, Ho, Wo


# ------------------------------ Pallas kernel ------------------------------ #
def _local_conv_vpu_kernel(cols_ref, w_ref, bias_ref, out_ref):
    # cols_ref: (B, K, TL)   w_ref: (C_out, K, TL)   bias_ref: (C_out, TL)
    # out_ref : (B, C_out, TL)        TL = lane-dense tile of L = Ho*Wo
    #
    #   out[b, c, :] = sum_k cols[b, k, :] * w[c, k, :] + bias[c, :]
    #
    # Pure VPU work (broadcast multiply + sublane reduction) with all 128 lanes
    # busy.  Accumulation stays in f32 (required on v5e, whose VPU has no bf16;
    # for f32 inputs the astype is a no-op).
    w = w_ref[...].astype(jnp.float32)             # (C_out, K, TL)
    bias = bias_ref[...].astype(jnp.float32)       # (C_out, TL)
    n_batch = cols_ref.shape[0]
    for b in range(n_batch):                       # small static batch -> unrolled
        xb = cols_ref[b].astype(jnp.float32)       # (K, TL)
        acc = jnp.sum(w * xb[None, :, :], axis=1)  # (C_out, TL), f32 accumulate
        out_ref[b] = (acc + bias).astype(out_ref.dtype)


def _choose_tile_l(l_pad):
    # Prefer bigger tiles (fewer ~0.35us grid steps) but keep >= 2 parallel
    # grid steps whenever possible so both v7x TensorCores get work.
    for cand in (512, 256):
        if l_pad % cand == 0 and l_pad // cand >= 2:
            return cand
    return 128


def _local_matmul_pallas(cols, w_ckl, bias_cl, out_dtype, tile_l=None):
    """cols (B,K,L) x w (C_out,K,L) + bias (C_out,L) -> out (B,C_out,L)."""
    B, K, L = cols.shape
    C_out = w_ckl.shape[0]

    # Lane-dense L axis: pad up to a multiple of 128 / tile_l (masked tail handled
    # by zero-padding instead of asserting divisibility).
    L_pad = 128 * pl.cdiv(L, 128)
    if tile_l is None:
        tile_l = _choose_tile_l(L_pad)
    assert tile_l % 128 == 0, "tile_l must be a multiple of the 128-lane width"
    L_pad = tile_l * pl.cdiv(L_pad, tile_l)

    if L_pad != L:
        pad3 = ((0, 0), (0, 0), (0, L_pad - L))
        cols = jnp.pad(cols, pad3)
        w_ckl = jnp.pad(w_ckl, pad3)
        bias_cl = jnp.pad(bias_cl, ((0, 0), (0, L_pad - L)))

    grid = (L_pad // tile_l,)
    out = pl.pallas_call(
        _local_conv_vpu_kernel,
        out_shape=jax.ShapeDtypeStruct((B, C_out, L_pad), out_dtype),
        grid_spec=pltpu.PrefetchScalarGridSpec(
            num_scalar_prefetch=0,
            grid=grid,
            in_specs=[
                pl.BlockSpec((B, K, tile_l), lambda i: (0, 0, i)),
                pl.BlockSpec((C_out, K, tile_l), lambda i: (0, 0, i)),
                pl.BlockSpec((C_out, tile_l), lambda i: (0, i)),
            ],
            out_specs=pl.BlockSpec((B, C_out, tile_l), lambda i: (0, 0, i)),
        ),
        compiler_params=pltpu.CompilerParams(
            dimension_semantics=("parallel",)),
    )(cols, w_ckl, bias_cl)

    if L_pad != L:
        out = out[..., :L]
    return out


# --------------------------- parameter preparation -------------------------- #
def prepare_conv2d_local_params(weight, bias):
    """One-time conversion of torch-layout parameters to the kernel layout.

    weight (Ho, Wo, C_out, C_in, kH, kW) -> (C_out, K, L)  (single transpose, done once)
    bias   (C_out, Ho, Wo)               -> (C_out, L)      (free reshape)
    """
    Ho, Wo, C_out, C_in, kH, kW = weight.shape
    L, K = Ho * Wo, C_in * kH * kW
    w_ckl = jnp.transpose(weight.reshape(L, C_out, K), (1, 2, 0))
    bias_cl = bias.reshape(C_out, L)
    return w_ckl, bias_cl


def conv2d_local_forward(x, w_ckl, bias_cl, *, kernel_size, stride, padding,
                         dilation, out_hw, tile_l=None):
    """Forward with pre-prepared (kernel-layout) parameters.  x is NCHW."""
    Ho, Wo = out_hw
    C_out = w_ckl.shape[0]
    cols, ho, wo = _unfold_nchw(x, kernel_size, stride, padding, dilation)  # (B, K, L)
    assert (ho, wo) == (Ho, Wo), "input geometry inconsistent with weight spatial dims"
    out_bcl = _local_matmul_pallas(cols, w_ckl, bias_cl, x.dtype, tile_l=tile_l)
    return out_bcl.reshape(x.shape[0], C_out, Ho, Wo)        # free reshape -> NCHW


def conv2d_local_pallas(x, weight, bias, stride=(1, 1), padding=(0, 0),
                        dilation=(1, 1), tile_l=None):
    """Drop-in equivalent of the torch conv2d_local forward (torch layouts in/out).

    Note: converts the weight layout on every call; for a hot loop prefer
    `prepare_conv2d_local_params` once + `conv2d_local_forward`.
    """
    Ho, Wo, C_out, C_in, kH, kW = weight.shape
    w_ckl, bias_cl = prepare_conv2d_local_params(weight, bias)
    return conv2d_local_forward(x, w_ckl, bias_cl, kernel_size=(kH, kW),
                                stride=stride, padding=padding,
                                dilation=dilation, out_hw=(Ho, Wo),
                                tile_l=tile_l)


# ---------------------------- pure-JAX reference ---------------------------- #
def _reference(x, weight, bias, stride, padding, dilation):
    Ho, Wo, C_out, C_in, kH, kW = weight.shape
    cols, _, _ = _unfold_nchw(x, (kH, kW), stride, padding, dilation)      # (B, K, L)
    cols = jnp.transpose(cols, (0, 2, 1))                                  # (B, L, K)
    w = weight.reshape(Ho * Wo, C_out, C_in * kH * kW).transpose(0, 2, 1)  # (L, K, C)
    out = jnp.einsum("blk,lkc->blc", cols, w)                              # (B, L, C)
    out = out.reshape(x.shape[0], Ho, Wo, C_out).transpose(0, 3, 1, 2)
    return out + bias[None]


if __name__ == "__main__":
    # Small deterministic config consistent with the module:
    #   in_size = (C_in=4, H=16, W=16), out_channels=8, kernel=3, stride=1, pad=1
    B, C_in, H, W = 2, 4, 16, 16
    C_out, kH, kW = 8, 3, 3
    stride, padding, dilation = (1, 1), (1, 1), (1, 1)
    Ho = (H + 2 * padding[0] - dilation[0] * (kH - 1) - 1) // stride[0] + 1
    Wo = (W + 2 * padding[1] - dilation[1] * (kW - 1) - 1) // stride[1] + 1

    key = jax.random.PRNGKey(0)
    kx, kw_, kb = jax.random.split(key, 3)

    stdv = 1.0 / (C_in * kH * kW) ** 0.5
    x = jax.random.normal(kx, (B, C_in, H, W), dtype=jnp.float32)
    weight = jax.random.uniform(kw_, (Ho, Wo, C_out, C_in, kH, kW),
                                minval=-stdv, maxval=stdv, dtype=jnp.float32)
    bias = jax.random.uniform(kb, (C_out, Ho, Wo),
                              minval=-stdv, maxval=stdv, dtype=jnp.float32)

    # One-time parameter layout conversion (kept resident), then jit the forward.
    w_ckl, bias_cl = prepare_conv2d_local_params(weight, bias)
    fwd = jax.jit(functools.partial(
        conv2d_local_forward, kernel_size=(kH, kW), stride=stride,
        padding=padding, dilation=dilation, out_hw=(Ho, Wo)))

    out = fwd(x, w_ckl, bias_cl)
    jax.block_until_ready(out)

    ref = _reference(x, weight, bias, stride, padding, dilation)
    assert out.shape == (B, C_out, Ho, Wo), out.shape
    assert jnp.allclose(out, ref, atol=1e-4, rtol=1e-4), "mismatch vs reference"
    print("KERNEL_OK")
</pallas_src>

<mosaic_0001>
module attributes {stable_mosaic.version = 11 : i64} {
  func.func @_local_conv_vpu_kernel(%arg0: i32, %arg1: memref<2x36x128xf32, #tpu.memory_space<vmem>>, %arg2: memref<8x36x128xf32, #tpu.memory_space<vmem>>, %arg3: memref<8x128xf32, #tpu.memory_space<vmem>>, %arg4: memref<2x8x128xf32, #tpu.memory_space<vmem>>) attributes {dimension_semantics = [#tpu.dimension_semantics<parallel>], iteration_bounds = array<i64: 2>, scalar_prefetch = 0 : i64, scratch_operands = 0 : i64, tpu.core_type = #tpu.core_type<tc>, window_params = [{transform_indices = @transform_0, window_bounds = array<i64: 2, 36, 128>}, {transform_indices = @transform_1, window_bounds = array<i64: 8, 36, 128>}, {transform_indices = @transform_2, window_bounds = array<i64: 8, 128>}, {transform_indices = @transform_3, window_bounds = array<i64: 2, 8, 128>}]} {
    %c0 = arith.constant 0 : index
    %c0_0 = arith.constant 0 : index
    %c0_1 = arith.constant 0 : index
    %0 = vector.load %arg2[%c0, %c0_0, %c0_1] : memref<8x36x128xf32, #tpu.memory_space<vmem>>, vector<8x36x128xf32>
    %c0_2 = arith.constant 0 : index
    %c0_3 = arith.constant 0 : index
    %1 = vector.load %arg3[%c0_2, %c0_3] : memref<8x128xf32, #tpu.memory_space<vmem>>, vector<8x128xf32>
    %c0_4 = arith.constant 0 : index
    %c0_5 = arith.constant 0 : index
    %c0_6 = arith.constant 0 : index
    %2 = vector.load %arg1[%c0_4, %c0_5, %c0_6] : memref<2x36x128xf32, #tpu.memory_space<vmem>>, vector<1x36x128xf32>
    %3 = vector.shape_cast %2 : vector<1x36x128xf32> to vector<36x128xf32>
    %4 = vector.shape_cast %3 : vector<36x128xf32> to vector<1x36x128xf32>
    %5 = vector.broadcast %4 : vector<1x36x128xf32> to vector<8x36x128xf32>
    %6 = arith.mulf %0, %5 : vector<8x36x128xf32>
    %cst = arith.constant dense<0.000000e+00> : vector<8x128xf32>
    %7 = vector.multi_reduction <add>, %6, %cst [1] : vector<8x36x128xf32> to vector<8x128xf32>
    %8 = arith.addf %7, %1 : vector<8x128xf32>
    %c0_7 = arith.constant 0 : index
    %c0_8 = arith.constant 0 : index
    %c0_9 = arith.constant 0 : index
    %9 = vector.load %arg4[%c0_7, %c0_8, %c0_9] : memref<2x8x128xf32, #tpu.memory_space<vmem>>, vector<1x8x128xf32>
    %10 = vector.shape_cast %9 : vector<1x8x128xf32> to vector<8x128xf32>
    %11 = vector.shape_cast %8 : vector<8x128xf32> to vector<1x8x128xf32>
    tpu.vector_store %arg4[%c0_7, %c0_8, %c0_9], %11 {strides = array<i32>} : memref<2x8x128xf32, #tpu.memory_space<vmem>>, vector<1x8x128xf32>,
    %c1 = arith.constant 1 : index
    %c0_10 = arith.constant 0 : index
    %c0_11 = arith.constant 0 : index
    %12 = vector.load %arg1[%c1, %c0_10, %c0_11] : memref<2x36x128xf32, #tpu.memory_space<vmem>>, vector<1x36x128xf32>
    %13 = vector.shape_cast %12 : vector<1x36x128xf32> to vector<36x128xf32>
    %14 = vector.shape_cast %13 : vector<36x128xf32> to vector<1x36x128xf32>
    %15 = vector.broadcast %14 : vector<1x36x128xf32> to vector<8x36x128xf32>
    %16 = arith.mulf %0, %15 : vector<8x36x128xf32>
    %cst_12 = arith.constant dense<0.000000e+00> : vector<8x128xf32>
    %17 = vector.multi_reduction <add>, %16, %cst_12 [1] : vector<8x36x128xf32> to vector<8x128xf32>
    %18 = arith.addf %17, %1 : vector<8x128xf32>
    %c1_13 = arith.constant 1 : index
    %c0_14 = arith.constant 0 : index
    %c0_15 = arith.constant 0 : index
    %19 = vector.load %arg4[%c1_13, %c0_14, %c0_15] : memref<2x8x128xf32, #tpu.memory_space<vmem>>, vector<1x8x128xf32>
    %20 = vector.shape_cast %19 : vector<1x8x128xf32> to vector<8x128xf32>
    %21 = vector.shape_cast %18 : vector<8x128xf32> to vector<1x8x128xf32>
    tpu.vector_store %arg4[%c1_13, %c0_14, %c0_15], %21 {strides = array<i32>} : memref<2x8x128xf32, #tpu.memory_space<vmem>>, vector<1x8x128xf32>,
    return
  }
  func.func @transform_0(%arg0: i32) -> (i32, i32, i32) {
    %c0_i32 = arith.constant 0 : i32
    %c0_i32_0 = arith.constant 0 : i32
    %c0_i32_1 = arith.constant 0 : i32
    return %c0_i32, %c0_i32_0, %arg0 : i32, i32, i32
  }
  func.func @transform_1(%arg0: i32) -> (i32, i32, i32) {
    %c0_i32 = arith.constant 0 : i32
    %c0_i32_0 = arith.constant 0 : i32
    %c0_i32_1 = arith.constant 0 : i32
    return %c0_i32, %c0_i32_0, %arg0 : i32, i32, i32
  }
  func.func @transform_2(%arg0: i32) -> (i32, i32) {
    %c0_i32 = arith.constant 0 : i32
    %c0_i32_0 = arith.constant 0 : i32
    return %c0_i32, %arg0 : i32, i32
  }
  func.func @transform_3(%arg0: i32) -> (i32, i32, i32) {
    %c0_i32 = arith.constant 0 : i32
    %c0_i32_0 = arith.constant 0 : i32
    %c0_i32_1 = arith.constant 0 : i32
    return %c0_i32, %c0_i32_0, %arg0 : i32, i32, i32
  }
}

</mosaic_0001>

<bundles_post_ra>
// kernel: conv2d_local_forward.1
= control target key start
LH: loop header
LB: loop body
LE: loop exit
PB: predicated region body
PF: predicated region fallthrough
CT: control target
= control target key end

     0   :  { %s1081_s12 = smov 0   ;;  %s1083_s13 = smov 0   ;;  %s1594_s0 = inlined_call_operand.vmem [shape: f32[2,36,256], index: 0, kind: input, shape index: {}]   ;;  %s1595_s1 = inlined_call_operand.vmem [shape: f32[8,36,256], index: 1, kind: input, shape index: {}]   ;;  %s1596_s2 = inlined_call_operand.vmem [shape: f32[8,256], index: 2, kind: input, shape index: {}]   ;;  %s1597_s3 = inlined_call_operand.vmem [shape: f32[2,8,256], index: 3, kind: output, shape index: {}]  }
   0x1   :  { %s1085_s14 = smov 0  }
   0x2 LB: > { %s1097_s15 = sadd.s32 4294967295, %s1059_s14   ;;  %s1100_s16 = sadd.s32 1, %s1059_s14   ;;  %s1059_s14 = sphi %s1085_s14, %s1655_s14   ;;  %s1055_s13 = sphi %s1083_s13, %s1654_s13   ;;  %s1051_s12 = sphi %s1081_s12, %s1653_s12  }
   0x3   : > { %s17_s17 = ssub.s32 %s1059_s14, %s1100_s16  ;;  %s20_s18 = sadd.s32 1, %s1055_s13 }
   0x4   : > { %p18_p0 = scmp.eq.s32.totalorder %s17_s17, 0  ;;  %p27_p1 = scmp.ne.s32.totalorder %s1055_s13, %s1051_s12 }
   0x5   : > { %p28_p2 = scmp.eq.s32.totalorder %s1059_s14, 0  ;;  %p109_p3 = scmp.eq.s32.totalorder %s1097_s15, 1 }
   0x6   : > { %s1110_s19 = scalar_select %p18_p0, %s1055_s13, %s20_s18  }
   0x7   : > { %p1112_p4 = por %p28_p2, %p27_p1  ;;  %p1116_p5 = por %p109_p3, %p27_p1 }
   0x8   : > { %p993_p6 = scmp.ge.s32.totalorder %s1059_s14, 2 }
   0xa   : > { %131 = sbr.rel (%p993_p6) target bundleno = 50 (0x32), region = 16 }
  0x11   : > { %134 = sbr.rel (!%p1112_p4) target bundleno = 26 (0x1a), region = 20  ;;  %s136_s22 = sand.u32 (%p1112_p4), 1, %s1055_s13  }
  0x12   : > { %s994_s23 = sshll.u32 (%p1112_p4), %s1059_s14, 3  ;;  %s1009_s24 = smul.u32 (%p1112_p4), 80, %s136_s22 }
  0x13   : > { %s140_s27 = scalar_lea.vmem (%p1112_p4), %s1594_s0, %s994_s23 }
  0x14   : > { %v186_v0 = vld [vmem:[%s140_s27] sm:$0xff] (%p1112_p4)  ;;  %v188_v1 = vld [vmem:[%s140_s27 + $0x10] sm:$0xff] (%p1112_p4)  ;;  %s138_s28 = scalar_lea.vmem (%p1112_p4), [#allocation2], %s1009_s24 }
  0x15   : > { %v190_v2 = vld [vmem:[%s140_s27 + $0x20] sm:$0xff] (%p1112_p4)  ;;  %v192_v3 = vld [vmem:[%s140_s27 + $0x30] sm:$0xff] (%p1112_p4)  ;;  %187 = vst [vmem:[%s138_s28] sm:$0xff] (%p1112_p4), %v186_v0  ;;  %189 = vst [vmem:[%s138_s28 + $0x8] sm:$0xff] (%p1112_p4), %v188_v1 }
  0x16   : > { %v194_v4 = vld [vmem:[%s140_s27 + $0x40] sm:$0xff] (%p1112_p4)  ;;  %v196_v5 = vld [vmem:[%s140_s27 + $0x50] sm:$0xff] (%p1112_p4)  ;;  %191 = vst [vmem:[%s138_s28 + $0x10] sm:$0xff] (%p1112_p4), %v190_v2  ;;  %193 = vst [vmem:[%s138_s28 + $0x18] sm:$0xff] (%p1112_p4), %v192_v3 }
  0x17   : > { %195 = vst [vmem:[%s138_s28 + $0x20] sm:$0xff] (%p1112_p4), %v194_v4  ;;  %197 = vst [vmem:[%s138_s28 + $0x28] sm:$0xff] (%p1112_p4), %v196_v5  ;;  %v198_v6 = vld [vmem:[%s140_s27 + $0x60] sm:$0xff] (%p1112_p4)  ;;  %v200_v7 = vld [vmem:[%s140_s27 + $0x70] sm:$0xff] (%p1112_p4) }
  0x18   : > { %v202_v8 = vld [vmem:[%s140_s27 + $0x80] sm:$0xff]  ;;  %199 = vst [vmem:[%s138_s28 + $0x30] sm:$0xff] %v198_v6  ;;  %201 = vst [vmem:[%s138_s28 + $0x38] sm:$0xff] %v200_v7  ;;  %v204_v9 = vld [vmem:[%s140_s27 + $0x90] sm:$0xff] }
  0x19   : > { %203 = vst [vmem:[%s138_s28 + $0x40] sm:$0xff] %v202_v8  ;;  %205 = vst [vmem:[%s138_s28 + $0x48] sm:$0xff] %v204_v9 }
  0x1a PF: > { %211 = sbr.rel (!%p1112_p4) target bundleno = 50 (0x32), region = 58  ;;  %s213_s29 = sand.u32 (%p1112_p4), 1, %s1055_s13  }
  0x1b   : > { %s995_s30 = sshll.u32 (%p1112_p4), %s1059_s14, 3  ;;  %s1010_s4 = smul.u32 (%p1112_p4), 320, %s213_s29 }
  0x1c   : > { %s1135_s7 = scalar_lea.vmem (%p1112_p4), %s1595_s1, %s995_s30 }
  0x1d   : > { %v323_v10 = vld [vmem:[%s1135_s7] sm:$0xff] (%p1112_p4)  ;;  %v325_v11 = vld [vmem:[%s1135_s7 + $0x10] sm:$0xff] (%p1112_p4)  ;;  %s1143_s8 = scalar_lea.vmem (%p1112_p4), [#allocation3], %s1010_s4 }
  0x1e   : > { %v327_v12 = vld [vmem:[%s1135_s7 + $0x20] sm:$0xff] (%p1112_p4)  ;;  %v329_v13 = vld [vmem:[%s1135_s7 + $0x30] sm:$0xff] (%p1112_p4)  ;;  %324 = vst [vmem:[%s1143_s8] sm:$0xff] (%p1112_p4), %v323_v10  ;;  %326 = vst [vmem:[%s1143_s8 + $0x8] sm:$0xff] (%p1112_p4), %v325_v11 }
  0x1f   : > { %v331_v14 = vld [vmem:[%s1135_s7 + $0x40] sm:$0xff] (%p1112_p4)  ;;  %v333_v15 = vld [vmem:[%s1135_s7 + $0x50] sm:$0xff] (%p1112_p4)  ;;  %328 = vst [vmem:[%s1143_s8 + $0x10] sm:$0xff] (%p1112_p4), %v327_v12  ;;  %330 = vst [vmem:[%s1143_s8 + $0x18] sm:$0xff] (%p1112_p4), %v329_v13 }
  0x20   : > { %332 = vst [vmem:[%s1143_s8 + $0x20] sm:$0xff] (%p1112_p4), %v331_v14  ;;  %334 = vst [vmem:[%s1143_s8 + $0x28] sm:$0xff] (%p1112_p4), %v333_v15  ;;  %v335_v16 = vld [vmem:[%s1135_s7 + $0x60] sm:$0xff] (%p1112_p4)  ;;  %v337_v17 = vld [vmem:[%s1135_s7 + $0x70] sm:$0xff] (%p1112_p4) }
  0x21   : > { %v339_v18 = vld [vmem:[%s1135_s7 + $0x80] sm:$0xff]  ;;  %336 = vst [vmem:[%s1143_s8 + $0x30] sm:$0xff] %v335_v16  ;;  %338 = vst [vmem:[%s1143_s8 + $0x38] sm:$0xff] %v337_v17  ;;  %v341_v19 = vld [vmem:[%s1135_s7 + $0x90] sm:$0xff] }
  0x22   : > { %340 = vst [vmem:[%s1143_s8 + $0x40] sm:$0xff] %v339_v18  ;;  %v343_v20 = vld [vmem:[%s1135_s7 + $0xa0] sm:$0xff]  ;;  %v345_v21 = vld [vmem:[%s1135_s7 + $0xb0] sm:$0xff]  ;;  %342 = vst [vmem:[%s1143_s8 + $0x48] sm:$0xff] %v341_v19 }
  0x23   : > { %344 = vst [vmem:[%s1143_s8 + $0x50] sm:$0xff] %v343_v20  ;;  %346 = vst [vmem:[%s1143_s8 + $0x58] sm:$0xff] %v345_v21  ;;  %v347_v22 = vld [vmem:[%s1135_s7 + $0xc0] sm:$0xff]  ;;  %v349_v23 = vld [vmem:[%s1135_s7 + $0xd0] sm:$0xff] }
  0x24   : > { %v351_v24 = vld [vmem:[%s1135_s7 + $0xe0] sm:$0xff]  ;;  %348 = vst [vmem:[%s1143_s8 + $0x60] sm:$0xff] %v347_v22  ;;  %350 = vst [vmem:[%s1143_s8 + $0x68] sm:$0xff] %v349_v23  ;;  %v353_v25 = vld [vmem:[%s1135_s7 + $0xf0] sm:$0xff] }
  0x25   : > { %352 = vst [vmem:[%s1143_s8 + $0x70] sm:$0xff] %v351_v24  ;;  %v355_v26 = vld [vmem:[%s1135_s7 + $0x100] sm:$0xff]  ;;  %v357_v27 = vld [vmem:[%s1135_s7 + $0x110] sm:$0xff]  ;;  %354 = vst [vmem:[%s1143_s8 + $0x78] sm:$0xff] %v353_v25 }
  0x26   : > { %356 = vst [vmem:[%s1143_s8 + $0x80] sm:$0xff] %v355_v26  ;;  %358 = vst [vmem:[%s1143_s8 + $0x88] sm:$0xff] %v357_v27  ;;  %v359_v28 = vld [vmem:[%s1135_s7 + $0x120] sm:$0xff]  ;;  %v361_v29 = vld [vmem:[%s1135_s7 + $0x130] sm:$0xff] }
  0x27   : > { %v363_v30 = vld [vmem:[%s1135_s7 + $0x140] sm:$0xff]  ;;  %360 = vst [vmem:[%s1143_s8 + $0x90] sm:$0xff] %v359_v28  ;;  %362 = vst [vmem:[%s1143_s8 + $0x98] sm:$0xff] %v361_v29  ;;  %v365_v31 = vld [vmem:[%s1135_s7 + $0x150] sm:$0xff] }
  0x28   : > { %364 = vst [vmem:[%s1143_s8 + $0xa0] sm:$0xff] %v363_v30  ;;  %v367_v32 = vld [vmem:[%s1135_s7 + $0x160] sm:$0xff]  ;;  %v369_v33 = vld [vmem:[%s1135_s7 + $0x170] sm:$0xff]  ;;  %366 = vst [vmem:[%s1143_s8 + $0xa8] sm:$0xff] %v365_v31 }
  0x29   : > { %368 = vst [vmem:[%s1143_s8 + $0xb0] sm:$0xff] %v367_v32  ;;  %370 = vst [vmem:[%s1143_s8 + $0xb8] sm:$0xff] %v369_v33  ;;  %v371_v34 = vld [vmem:[%s1135_s7 + $0x180] sm:$0xff]  ;;  %v373_v35 = vld [vmem:[%s1135_s7 + $0x190] sm:$0xff] }
  0x2a   : > { %v375_v36 = vld [vmem:[%s1135_s7 + $0x1a0] sm:$0xff]  ;;  %372 = vst [vmem:[%s1143_s8 + $0xc0] sm:$0xff] %v371_v34  ;;  %374 = vst [vmem:[%s1143_s8 + $0xc8] sm:$0xff] %v373_v35  ;;  %v377_v37 = vld [vmem:[%s1135_s7 + $0x1b0] sm:$0xff] }
  0x2b   : > { %376 = vst [vmem:[%s1143_s8 + $0xd0] sm:$0xff] %v375_v36  ;;  %v379_v38 = vld [vmem:[%s1135_s7 + $0x1c0] sm:$0xff]  ;;  %v381_v39 = vld [vmem:[%s1135_s7 + $0x1d0] sm:$0xff]  ;;  %378 = vst [vmem:[%s1143_s8 + $0xd8] sm:$0xff] %v377_v37 }
  0x2c   : > { %380 = vst [vmem:[%s1143_s8 + $0xe0] sm:$0xff] %v379_v38  ;;  %382 = vst [vmem:[%s1143_s8 + $0xe8] sm:$0xff] %v381_v39  ;;  %v383_v40 = vld [vmem:[%s1135_s7 + $0x1e0] sm:$0xff]  ;;  %v385_v41 = vld [vmem:[%s1135_s7 + $0x1f0] sm:$0xff] }
  0x2d   : > { %v387_v42 = vld [vmem:[%s1135_s7 + $0x200] sm:$0xff]  ;;  %384 = vst [vmem:[%s1143_s8 + $0xf0] sm:$0xff] %v383_v40  ;;  %386 = vst [vmem:[%s1143_s8 + $0xf8] sm:$0xff] %v385_v41  ;;  %v389_v43 = vld [vmem:[%s1135_s7 + $0x210] sm:$0xff] }
  0x2e   : > { %388 = vst [vmem:[%s1143_s8 + $0x100] sm:$0xff] %v387_v42  ;;  %v391_v44 = vld [vmem:[%s1135_s7 + $0x220] sm:$0xff]  ;;  %v393_v45 = vld [vmem:[%s1135_s7 + $0x230] sm:$0xff]  ;;  %390 = vst [vmem:[%s1143_s8 + $0x108] sm:$0xff] %v389_v43 }
  0x2f   : > { %392 = vst [vmem:[%s1143_s8 + $0x110] sm:$0xff] %v391_v44  ;;  %394 = vst [vmem:[%s1143_s8 + $0x118] sm:$0xff] %v393_v45  ;;  %v395_v46 = vld [vmem:[%s1135_s7 + $0x240] sm:$0xff]  ;;  %v397_v47 = vld [vmem:[%s1135_s7 + $0x250] sm:$0xff] }
  0x30   : > { %v399_v48 = vld [vmem:[%s1135_s7 + $0x260] sm:$0xff]  ;;  %396 = vst [vmem:[%s1143_s8 + $0x120] sm:$0xff] %v395_v46  ;;  %398 = vst [vmem:[%s1143_s8 + $0x128] sm:$0xff] %v397_v47  ;;  %v401_v49 = vld [vmem:[%s1135_s7 + $0x270] sm:$0xff] }
  0x31   : > { %400 = vst [vmem:[%s1143_s8 + $0x130] sm:$0xff] %v399_v48  ;;  %402 = vst [vmem:[%s1143_s8 + $0x138] sm:$0xff] %v401_v49 }
  0x32 PF: > { %p996_p7 = scmp.ge.s32.totalorder %s1059_s14, 1  ;;  %p414_p8 = scmp.lt.s32.totalorder %s1059_s14, 3 }
  0x34   : > { %p415_p9 = pnand %p996_p7, %p414_p8 }
  0x36   : > { %418 = sbr.rel (%p415_p9) target bundleno = 165 (0xa5), region = 100 }
  0x3d   : > { %s1222_s9 = sand.u32 1, %s1051_s12   ;;  %vm551_vm0 = vcmask 1043456   ;;  %p458_p10 = scmp.lt.s32.totalorder %s1097_s15, 1  ;;  %vm670_vm1 = vcmask 1041409   ;;  %vm673_vm2 = vcmask 1042434   ;;  %vm676_vm3 = vcmask 1043459  }
  0x3e   : > { %s1011_s10 = smul.u32 80, %s1222_s9  ;;  %vm679_vm4 = vcmask 1044484   ;;  %vm682_vm5 = vcmask 1045509   ;;  %vm685_vm6 = vcmask 1046534   ;;  %vm688_vm7 = vcmask 1047559   ;;  %s997_s24 = sshll.u32 %s1222_s9, 4 }
  0x3f   : > { %s1012_s11 = smul.u32 320, %s1222_s9  ;;  %s1531_s25 = scalar_lea.vmem [#allocation4], %s997_s24 }
  0x40   : > { %s1226_s17 = scalar_lea.vmem [#allocation2], %s1011_s10  ;;  %s1006_s26 = sshll.u32 (%p1116_p5), %s1097_s15, 3 }
  0x41   : > { %v1229_v50 = vld [vmem:[%s1226_s17] sm:$0xff]  ;;  %s1231_s18 = scalar_lea.vmem [#allocation3], %s1012_s11  ;;  %v1240_v53 = vld [vmem:[%s1226_s17 + $0x8] sm:$0xff]  ;;  %v1246_v55 = vld [vmem:[%s1226_s17 + $0x10] sm:$0xff]  ;;  %s867_s29 = scalar_lea.vmem (%p1116_p5), %s1597_s3, %s1006_s26 }
  0x42   : > { %v1234_v51 = vld [vmem:[%s1231_s18] sm:$0xff]  ;;  %v1237_v52 = vld [vmem:[%s1231_s18 + $0x8] sm:$0xff]  ;;  %v1249_v56 = vld [vmem:[%s1231_s18 + $0x10] sm:$0xff]  ;;  %s1438_s12 = scalar_select %p458_p10, %s1097_s15, 1 }
  0x43   : > { %v1243_v54 = vld [vmem:[%s1231_s18 + $0x28] sm:$0xff]  ;;  %v1252_v57 = vld [vmem:[%s1231_s18 + $0x30] sm:$0xff]  ;;  %v1255_v58 = vld [vmem:[%s1231_s18 + $0x38] sm:$0xff]  ;;  %v508_v59 = vmul.f32 %v1229_v50, %v1234_v51  ;;  %v509_v60 = vmul.f32 %v1240_v53, %v1237_v52  ;;  %v510_v7 = vmul.f32 %v1246_v55, %v1249_v56 }
  0x44   : > { %v513_v61 = vmul.f32 %v1229_v50, %v1243_v54  ;;  %v1264_v62 = vld [vmem:[%s1231_s18 + $0x50] sm:$0xff]  ;;  %v1267_v63 = vld [vmem:[%s1231_s18 + $0x58] sm:$0xff]  ;;  %v514_v0 = vmul.f32 %v1240_v53, %v1252_v57  ;;  %v1272_v1 = vld [vmem:[%s1231_s18 + $0x60] sm:$0xff]  ;;  %v515_v8 = vmul.f32 %v1246_v55, %v1255_v58  ;;  %s998_s14 = sshll.u32 %s1438_s12, 3 }
  0x45   : > { %v518_v2 = vmul.f32 %v1229_v50, %v1264_v62  ;;  %v519_v3 = vmul.f32 %v1240_v53, %v1267_v63  ;;  %v1279_v4 = vld [vmem:[%s1231_s18 + $0x78] sm:$0xff]  ;;  %v1282_v5 = vld [vmem:[%s1231_s18 + $0x80] sm:$0xff]  ;;  %v1285_v6 = vld [vmem:[%s1231_s18 + $0x88] sm:$0xff]  ;;  %v548_v12 = vadd.f32 %v509_v60, %v508_v59  ;;  %v520_v16 = vmul.f32 %v1246_v55, %v1272_v1  ;;  %s461_s23 = scalar_lea.vmem %s1596_s2, %s998_s14 }
  0x46   : > { %v1292_v9 = vld [vmem:[%s1231_s18 + $0xa0] sm:$0xff]  ;;  %v523_v10 = vmul.f32 %v1229_v50, %v1279_v4  ;;  %v524_v11 = vmul.f32 %v1240_v53, %v1282_v5  ;;  %v560_v13 = vadd.f32 %v514_v0, %v513_v61  ;;  %v1299_v14 = vld [vmem:[%s1231_s18 + $0xa8] sm:$0xff]  ;;  %v1302_v15 = vld [vmem:[%s1231_s18 + $0xb0] sm:$0xff]  ;;  %v525_v21 = vmul.f32 %v1246_v55, %v1285_v6 }
  0x47   : > { %1618 = vst [vmem:[#allocation5_spill] sm:$0xff] %v1299_v14  ;;  %1619 = vst [vmem:[#allocation6_spill] sm:$0xff] %v1302_v15  ;;  %v528_v17 = vmul.f32 %v1229_v50, %v1292_v9  ;;  %v571_v18 = vadd.f32 %v519_v3, %v518_v2  ;;  %v1309_v19 = vld [vmem:[%s1231_s18 + $0xc8] sm:$0xff]  ;;  %v1312_v20 = vld [vmem:[%s1231_s18 + $0xd0] sm:$0xff]  ;;  %v529_v22 = vmul.f32 %v1240_v53, %v1299_v14 }
  0x48   : > { %1620 = vst [vmem:[#allocation7_spill] sm:$0xff] %v1309_v19  ;;  %1621 = vst [vmem:[#allocation8_spill] sm:$0xff] %v1312_v20  ;;  %v530_v23 = vmul.f32 %v1246_v55, %v1302_v15  ;;  %v582_v24 = vadd.f32 %v524_v11, %v523_v10  ;;  %v1321_v25 = vld [vmem:[%s1231_s18 + $0x18] sm:$0xff]  ;;  %v1324_v26 = vld [vmem:[%s1231_s18 + $0x40] sm:$0xff]  ;;  %v533_v30 = vmul.f32 %v1229_v50, %v1309_v19 }
  0x49   : > { %v1327_v27 = vld [vmem:[%s1231_s18 + $0x68] sm:$0xff]  ;;  %v1330_v28 = vld [vmem:[%s1231_s18 + $0x90] sm:$0xff]  ;;  %v1333_v29 = vld [vmem:[%s1231_s18 + $0xd8] sm:$0xff]  ;;  %v534_v31 = vmul.f32 %v1240_v53, %v1312_v20  ;;  %v549_v40 = vadd.f32 %v548_v12, %v510_v7  ;;  %v561_v41 = vadd.f32 %v560_v13, %v515_v8  ;;  %v593_v42 = vadd.f32 %v529_v22, %v528_v17 }
  0x4a   : > { %1622 = vst [vmem:[#allocation9_spill] sm:$0xff] %v1333_v29  ;;  %v1340_v32 = vld [vmem:[%s1231_s18 + $0x20] sm:$0xf]  ;;  %v1343_v33 = vld [vmem:[%s1231_s18 + $0x48] sm:$0xf]  ;;  %v1352_v36 = vld [vmem:[%s1231_s18 + $0xf0] sm:$0xff]  ;;  %v535_v39 = vmul.f32 %v1246_v55, %v1333_v29  ;;  %v572_v49 = vadd.f32 %v571_v18, %v520_v16  ;;  %v583_v7 = vadd.f32 %v582_v24, %v525_v21 }
  0x4b   : > { %v1346_v34 = vld [vmem:[%s1231_s18 + $0x70] sm:$0xf]  ;;  %v1349_v35 = vld [vmem:[%s1231_s18 + $0x98] sm:$0xf]  ;;  %1623 = vst [vmem:[#allocation10_spill] sm:$0xff] %v1352_v36  ;;  %v1358_v38 = vld [vmem:[%s1231_s18 + $0x100] sm:$0xff]  ;;  %v538_v47 = vmul.f32 %v1229_v50, %v1352_v36  ;;  %v604_v59 = vadd.f32 %v534_v31, %v533_v30  ;;  %v594_v8 = vadd.f32 %v593_v42, %v530_v23 }
  0x4c   : > { %v1355_v37 = vld [vmem:[%s1231_s18 + $0xf8] sm:$0xff]  ;;  %1625 = vst [vmem:[#allocation12_spill] sm:$0xff] %v1358_v38  ;;  %v1366_v44 = vld [vmem:[%s1231_s18 + $0xc0] sm:$0xf]  ;;  %v1379_v60 = vld [vmem:[%s1231_s18 + $0xe8] sm:$0xf]  ;;  %v540_v2 = vmul.f32 %v1246_v55, %v1358_v38 }
  0x4d   : > { %1624 = vst [vmem:[#allocation11_spill] sm:$0xff] %v1355_v37  ;;  %v1363_v43 = vld [vmem:[%s1231_s18 + $0xb8] sm:$0xff]  ;;  %1627 = vst [vmem:[#allocation14_spill] sm:$0xff] %v1366_v44  ;;  %v1369_v45 = vld [vmem:[%s1231_s18 + $0xe0] sm:$0xff]  ;;  %v539_v48 = vmul.f32 %v1240_v53, %v1355_v37  ;;  %v605_v17 = vadd.f32 %v604_v59, %v535_v39 }
  0x4e   : > { %1626 = vst [vmem:[#allocation13_spill] sm:$0xff] %v1363_v43  ;;  %1628 = vst [vmem:[#allocation15_spill] sm:$0xff] %v1369_v45  ;;  %v1372_v46 = vld [vmem:[%s1231_s18 + $0x118] sm:$0xff]  ;;  %v1382_v61 = vld [vmem:[%s1231_s18 + $0x120] sm:$0xff] }
  0x4f   : > { %1629 = vst [vmem:[#allocation16_spill] sm:$0xff] %v1372_v46  ;;  %1630 = vst [vmem:[#allocation17_spill] sm:$0xff] %v1379_v60  ;;  %v1385_v0 = vld [vmem:[%s1231_s18 + $0x128] sm:$0xff]  ;;  %v1391_v3 = vmul.f32 %v1229_v50, %v1372_v46  ;;  %v1397_v11 = vld [vmem:[%s1231_s18 + $0x110] sm:$0xf]  ;;  %v544_v13 = vmul.f32 %v1240_v53, %v1382_v61  ;;  %v615_v18 = vadd.f32 %v539_v48, %v538_v47 }
  0x50   : > { %1631 = vst [vmem:[#allocation18_spill] sm:$0xff] %v1382_v61  ;;  %1632 = vst [vmem:[#allocation19_spill] sm:$0xff] %v1385_v0  ;;  %v1394_v10 = vld [vmem:[%s1231_s18 + $0x108] sm:$0xff]  ;;  %v1404_v16 = vmul.f32 %v1246_v55, %v1385_v0  ;;  %v1407_v22 = vld [vmem:[%s1231_s18 + $0x130] sm:$0xff] }
  0x51   : > { %1633 = vst [vmem:[#allocation20_spill] sm:$0xff] %v1394_v10  ;;  %1634 = vst [vmem:[#allocation21_spill] sm:$0xff] %v1397_v11  ;;  %v506_v12 = vld [vmem:[%s1226_s17 + $0x18] sm:$0xff]  ;;  %v507_v21 = vld [vmem:[%s1226_s17 + $0x20] sm:$0xf] }
  0x52   : > { %v1410_v50 = vld [vmem:[%s1231_s18 + $0x138] sm:$0xf]  ;;  %v511_v23 = vmul.f32 %v506_v12, %v1321_v25  ;;  %v516_v24 = vmul.f32 %v506_v12, %v1324_v26  ;;  %v521_v30 = vmul.f32 %v506_v12, %v1327_v27  ;;  %v526_v53 = vmul.f32 %v506_v12, %v1330_v28 }
  0x53   : > { %v512_v31 = vmul.f32 %v507_v21, %v1340_v32  ;;  %v517_v55 = vmul.f32 %v507_v21, %v1343_v33  ;;  %v522_v39 = vmul.f32 %v507_v21, %v1346_v34  ;;  %v527_v42 = vmul.f32 %v507_v21, %v1349_v35 }
  0x54   : > { %v531_v47 = vmul.f32 %v506_v12, %v1363_v43  ;;  %v532_v48 = vmul.f32 %v507_v21, %v1366_v44  ;;  %v536_v59 = vmul.f32 %v506_v12, %v1369_v45  ;;  %v537_v0 = vmul.f32 %v507_v21, %v1379_v60 }
  0x55   : > { %v541_v61 = vmul.f32 %v506_v12, %v1394_v10  ;;  %v542_v46 = vmul.f32 %v507_v21, %v1397_v11  ;;  %v546_v38 = vmul.f32 %v506_v12, %v1407_v22  ;;  %v547_v37 = vmul.f32 %v507_v21, %v1410_v50 }
  0x56   : > { %v550_v36 = vadd.f32 %v549_v40, %v511_v23  ;;  %v552_v29 = vsel %vm551_vm0, %v512_v31, 0.0  ;;  %v562_v20 = vadd.f32 %v561_v41, %v516_v24  ;;  %v563_v19 = vsel %vm551_vm0, %v517_v55, 0.0 }
  0x57   : > { %v573_v45 = vadd.f32 %v572_v49, %v521_v30  ;;  %v574_v60 = vsel %vm551_vm0, %v522_v39, 0.0  ;;  %v584_v44 = vadd.f32 %v583_v7, %v526_v53  ;;  %v585_v10 = vsel %vm551_vm0, %v527_v42, 0.0 }
  0x58   : > { %v553_v43 = vadd.f32 %v552_v29, %v550_v36  ;;  %v564_v15 = vadd.f32 %v563_v19, %v562_v20  ;;  %v595_v14 = vadd.f32 %v594_v8, %v531_v47  ;;  %v596_v11 = vsel %vm551_vm0, %v532_v48, 0.0 }
  0x59   : > { %v575_v40 = vadd.f32 %v574_v60, %v573_v45  ;;  %v586_v12 = vadd.f32 %v585_v10, %v584_v44  ;;  %v606_v41 = vadd.f32 %v605_v17, %v536_v59  ;;  %v607_v21 = vsel %vm551_vm0, %v537_v0, 0.0 }
  0x5a   : > { %v554_v49 = vrot.slane %v553_v43, 4  ;;  %v565_v23 = vrot.slane %v564_v15, 4  ;;  %v597_v24 = vadd.f32 %v596_v11, %v595_v14  ;;  %v616_v7 = vadd.f32 %v615_v18, %v540_v2 }
  0x5b   : > { %v576_v30 = vrot.slane %v575_v40, 4  ;;  %v587_v53 = vrot.slane %v586_v12, 4  ;;  %v608_v29 = vadd.f32 %v607_v21, %v606_v41  ;;  %v618_v19 = vsel %vm551_vm0, %v542_v46, 0.0  ;;  %v1448_v41 = vld [vmem:[%s461_s23] sm:$0xff] }
  0x5c   : > { %v555_v20 = vadd.f32 %v554_v49, %v553_v43  ;;  %v566_v36 = vadd.f32 %v565_v23, %v564_v15  ;;  %v598_v8 = vrot.slane %v597_v24, 4  ;;  %v617_v31 = vadd.f32 %v616_v7, %v541_v61 }
  0x5d   : > { %v577_v45 = vadd.f32 %v576_v30, %v575_v40  ;;  %v588_v60 = vadd.f32 %v587_v53, %v586_v12  ;;  %v609_v44 = vrot.slane %v608_v29, 4  ;;  %v626_v10 = vadd.f32 %v544_v13, %v1391_v3 }
  0x5e   : > { %v556_v0 = vrot.slane %v555_v20, 2  ;;  %v567_v17 = vrot.slane %v566_v36, 2  ;;  %v599_v55 = vadd.f32 %v598_v8, %v597_v24  ;;  %v619_v14 = vadd.f32 %v618_v19, %v617_v31 }
  0x5f   : > { %v578_v2 = vrot.slane %v577_v45, 2  ;;  %v589_v11 = vrot.slane %v588_v60, 2  ;;  %v610_v18 = vadd.f32 %v609_v44, %v608_v29  ;;  %v627_v39 = vadd.f32 %v626_v10, %v1404_v16 }
  0x60   : > { %v557_v15 = vadd.f32 %v556_v0, %v555_v20  ;;  %v568_v43 = vadd.f32 %v567_v17, %v566_v36  ;;  %v600_v46 = vrot.slane %v599_v55, 2  ;;  %v620_v61 = vrot.slane %v619_v14, 4 }
  0x61   : > { %v579_v42 = vadd.f32 %v578_v2, %v577_v45  ;;  %v590_v47 = vadd.f32 %v589_v11, %v588_v60  ;;  %v611_v3 = vrot.slane %v610_v18, 2  ;;  %v628_v13 = vadd.f32 %v627_v39, %v546_v38 }
  0x62   : > { %v558_v48 = vrot.slane %v557_v15, 1  ;;  %v569_v59 = vrot.slane %v568_v43, 1  ;;  %v601_v40 = vadd.f32 %v600_v46, %v599_v55  ;;  %v621_v12 = vadd.f32 %v620_v61, %v619_v14 }
  0x63   : > { %v580_v16 = vrot.slane %v579_v42, 1  ;;  %v591_v21 = vrot.slane %v590_v47, 1  ;;  %v612_v49 = vadd.f32 %v611_v3, %v610_v18  ;;  %v629_v23 = vsel %vm551_vm0, %v547_v37, 0.0 }
  0x64   : > { %v559_v24 = vadd.f32 %v558_v48, %v557_v15  ;;  %v570_v7 = vadd.f32 %v569_v59, %v568_v43  ;;  %v602_v30 = vrot.slane %v601_v40, 1  ;;  %v622_v53 = vrot.slane %v621_v12, 2 }
  0x65   : > { %v581_v29 = vadd.f32 %v580_v16, %v579_v42  ;;  %v592_v38 = vadd.f32 %v591_v21, %v590_v47  ;;  %v613_v19 = vrot.slane %v612_v49, 1  ;;  %v630_v20 = vadd.f32 %v629_v23, %v628_v13  ;;  %v1470_v42 = vld [vmem:[%s1226_s17 + $0x28] sm:$0xff]  ;;  %v1000_v21 = vld [vmem:[%s1226_s17 + $0x30] sm:$0xff] }
  0x66   : > { %v603_v36 = vadd.f32 %v602_v30, %v601_v40  ;;  %v623_v8 = vadd.f32 %v622_v53, %v621_v12  ;;  %v638_v31 = vrot.slane %v1448_v41, 1  ;;  %v639_v45 = vrot.slane %v1448_v41, 2  ;;  %v1003_v30 = vld [vmem:[%s1226_s17 + $0x48] sm:$0xf] }
  0x67   : > { %v614_v60 = vadd.f32 %v613_v19, %v612_v49  ;;  %v631_v37 = vrot.slane %v630_v20, 4  ;;  %v640_v44 = vrot.slane %v1448_v41, 3  ;;  %v641_v10 = vrot.slane %v1448_v41, 4  ;;  %v1001_v49 = vld [vmem:[%s1226_s17 + $0x38] sm:$0xff] }
  0x68   : > { %v624_v0 = vrot.slane %v623_v8, 1  ;;  %v642_v17 = vrot.slane %v1448_v41, 5  ;;  %v643_v55 = vrot.slane %v1448_v41, 6  ;;  %v1615_v14 = vrot.slane %v1448_v41, 7 }
  0x69   : > { %v632_v2 = vadd.f32 %v631_v37, %v630_v20  ;;  %v653_v11 = vadd.f32 %v559_v24, %v1448_v41  ;;  %v654_v18 = vadd.f32 %v638_v31, %v570_v7  ;;  %v655_v39 = vadd.f32 %v639_v45, %v581_v29  ;;  %v1002_v7 = vld [vmem:[%s1226_s17 + $0x40] sm:$0xff] }
  0x6a   : > { %v625_v15 = vadd.f32 %v624_v0, %v623_v8  ;;  %v656_v43 = vadd.f32 %v640_v44, %v592_v38  ;;  %v657_v46 = vadd.f32 %v641_v10, %v603_v36  ;;  %v658_v61 = vadd.f32 %v642_v17, %v614_v60 }
  0x6b   : > { %v633_v47 = vrot.slane %v632_v2, 2  ;;  %v669_v3 = vrot.slane %v654_v18, 7  ;;  %v672_v13 = vrot.slane %v655_v39, 6  ;;  %v1474_v48 = vmul.f32 %v1470_v42, %v1234_v51 }
  0x6c   : > { %v659_v59 = vadd.f32 %v643_v55, %v625_v15  ;;  %v675_v40 = vrot.slane %v656_v43, 5  ;;  %v678_v12 = vrot.slane %v657_v46, 4  ;;  %v681_v16 = vrot.slane %v658_v61, 3  ;;  %v1636_v61 = vld [vmem:[#allocation6_spill] sm:$0xff] }
  0x6d   : > { %v634_v23 = vadd.f32 %v633_v47, %v632_v2  ;;  %v671_v24 = vsel %vm670_vm1, %v669_v3, %v653_v11  ;;  %v699_v53 = vmul.f32 %v1000_v21, %v1237_v52  ;;  %v700_v29 = vmul.f32 %v1001_v49, %v1249_v56  ;;  %v1637_v3 = vld [vmem:[#allocation13_spill] sm:$0xff] }
  0x6e   : > { %v674_v51 = vsel %vm673_vm2, %v672_v13, %v671_v24  ;;  %v684_v38 = vrot.slane %v659_v59, 2  ;;  %v1487_v19 = vmul.f32 %v1002_v7, %v1321_v25  ;;  %v702_v20 = vmul.f32 %v1003_v30, %v1340_v32  ;;  %v1638_v59 = vld [vmem:[#allocation14_spill] sm:$0xff]  ;;  %v1643_v24 = vld [vmem:[#allocation17_spill] sm:$0xff] }
  0x6f   : > { %v635_v36 = vrot.slane %v634_v23, 1  ;;  %v677_v8 = vsel %vm676_vm3, %v675_v40, %v674_v51  ;;  %v703_v60 = vmul.f32 %v1470_v42, %v1243_v54  ;;  %v704_v37 = vmul.f32 %v1000_v21, %v1252_v57  ;;  %v1639_v40 = vld [vmem:[#allocation7_spill] sm:$0xff] }
  0x70   : > { %v680_v52 = vsel %vm679_vm4, %v678_v12, %v677_v8  ;;  %v705_v56 = vmul.f32 %v1001_v49, %v1255_v58  ;;  %v706_v0 = vmul.f32 %v1002_v7, %v1324_v26  ;;  %v707_v2 = vmul.f32 %v1003_v30, %v1343_v33  ;;  %v1645_v8 = vld [vmem:[#allocation11_spill] sm:$0xff] }
  0x71   : > { %v636_v25 = vadd.f32 %v635_v36, %v634_v23  ;;  %v683_v11 = vsel %vm682_vm5, %v681_v16, %v680_v52  ;;  %v708_v32 = vmul.f32 %v1470_v42, %v1264_v62  ;;  %v709_v18 = vmul.f32 %v1000_v21, %v1267_v63 }
  0x72   : > { %v686_v54 = vsel %vm685_vm6, %v684_v38, %v683_v11  ;;  %v710_v57 = vmul.f32 %v1001_v49, %v1272_v1  ;;  %v711_v39 = vmul.f32 %v1002_v7, %v1327_v27  ;;  %v712_v58 = vmul.f32 %v1003_v30, %v1346_v34  ;;  %v1635_v27 = vld [vmem:[#allocation5_spill] sm:$0xff]  ;;  %v1644_v38 = vld [vmem:[#allocation10_spill] sm:$0xff] }
  0x73   : > { %v660_v26 = vadd.f32 %v1615_v14, %v636_v25  ;;  %v713_v33 = vmul.f32 %v1470_v42, %v1279_v4  ;;  %v714_v15 = vmul.f32 %v1000_v21, %v1282_v5  ;;  %v715_v62 = vmul.f32 %v1001_v49, %v1285_v6  ;;  %v1640_v6 = vld [vmem:[#allocation8_spill] sm:$0xff] }
  0x74   : > { %v716_v63 = vmul.f32 %v1002_v7, %v1330_v28  ;;  %v717_v43 = vmul.f32 %v1003_v30, %v1349_v35  ;;  %v718_v1 = vmul.f32 %v1470_v42, %v1292_v9  ;;  %v719_v46 = vmul.f32 %v1000_v21, %v1635_v27  ;;  %v1641_v28 = vld [vmem:[#allocation9_spill] sm:$0xff]  ;;  %v1642_v35 = vld [vmem:[#allocation15_spill] sm:$0xff]  ;;  %v1646_v25 = vld [vmem:[#allocation12_spill] sm:$0xff] }
  0x75   : > { %v687_v34 = vrot.slane %v660_v26, 1  ;;  %v720_v47 = vmul.f32 %v1001_v49, %v1636_v61  ;;  %v721_v13 = vmul.f32 %v1002_v7, %v1637_v3  ;;  %v722_v4 = vmul.f32 %v1003_v30, %v1638_v59  ;;  %v1647_v26 = vld [vmem:[#allocation20_spill] sm:$0xff]  ;;  %v1648_v61 = vld [vmem:[#allocation21_spill] sm:$0xff] }
  0x76   : > { %v723_v5 = vmul.f32 %v1470_v42, %v1639_v40  ;;  %v724_v12 = vmul.f32 %v1000_v21, %v1640_v6  ;;  %v725_v16 = vmul.f32 %v1001_v49, %v1641_v28  ;;  %v726_v23 = vmul.f32 %v1002_v7, %v1642_v35  ;;  %v1649_v59 = vld [vmem:[#allocation16_spill] sm:$0xff]  ;;  %v1651_v6 = vld [vmem:[#allocation19_spill] sm:$0xff] }
  0x77   : > { %v689_v9 = vsel %vm688_vm7, %v687_v34, %v686_v54  ;;  %v727_v51 = vmul.f32 %v1003_v30, %v1643_v24  ;;  %v728_v36 = vmul.f32 %v1470_v42, %v1644_v38  ;;  %v729_v52 = vmul.f32 %v1000_v21, %v1645_v8  ;;  %v1650_v34 = vld [vmem:[#allocation18_spill] sm:$0xff] }
  0x78   : > { %691 = vst [vmem:[%s1531_s25] sm:$0xff] %v689_v9  ;;  %v730_v11 = vmul.f32 %v1001_v49, %v1646_v25  ;;  %v731_v27 = vmul.f32 %v1002_v7, %v1647_v26  ;;  %v732_v3 = vmul.f32 %v1003_v30, %v1648_v61  ;;  %v733_v54 = vmul.f32 %v1470_v42, %v1649_v59 }
  0x79   : > { %v734_v40 = vmul.f32 %v1000_v21, %v1650_v34  ;;  %v735_v28 = vmul.f32 %v1001_v49, %v1651_v6  ;;  %v736_v35 = vmul.f32 %v1002_v7, %v1407_v22  ;;  %v737_v24 = vmul.f32 %v1003_v30, %v1410_v50 }
  0x7a   : > { %v738_v38 = vadd.f32 %v699_v53, %v1474_v48  ;;  %v741_v9 = vsel %vm551_vm0, %v702_v20, 0.0  ;;  %v749_v8 = vadd.f32 %v704_v37, %v703_v60  ;;  %v752_v25 = vsel %vm551_vm0, %v707_v2, 0.0 }
  0x7b   : > { %v760_v26 = vadd.f32 %v709_v18, %v708_v32  ;;  %v763_v61 = vsel %vm551_vm0, %v712_v58, 0.0  ;;  %v771_v14 = vadd.f32 %v714_v15, %v713_v33  ;;  %v774_v42 = vsel %vm551_vm0, %v717_v43, 0.0 }
  0x7c   : > { %v739_v21 = vadd.f32 %v738_v38, %v700_v29  ;;  %v750_v59 = vadd.f32 %v749_v8, %v705_v56  ;;  %v782_v49 = vadd.f32 %v719_v46, %v718_v1  ;;  %v785_v22 = vsel %vm551_vm0, %v722_v4, 0.0 }
  0x7d   : > { %v761_v7 = vadd.f32 %v760_v26, %v710_v57  ;;  %v772_v50 = vadd.f32 %v771_v14, %v715_v62  ;;  %v793_v30 = vadd.f32 %v724_v12, %v723_v5  ;;  %v796_v48 = vsel %vm551_vm0, %v727_v51, 0.0 }
  0x7e   : > { %v740_v53 = vadd.f32 %v739_v21, %v1487_v19  ;;  %v751_v20 = vadd.f32 %v750_v59, %v706_v0  ;;  %v783_v60 = vadd.f32 %v782_v49, %v720_v47  ;;  %v804_v37 = vadd.f32 %v729_v52, %v728_v36 }
  0x7f   : > { %v762_v2 = vadd.f32 %v761_v7, %v711_v39  ;;  %v773_v32 = vadd.f32 %v772_v50, %v716_v63  ;;  %v794_v18 = vadd.f32 %v793_v30, %v725_v16  ;;  %v807_v58 = vsel %vm551_vm0, %v732_v3, 0.0 }
  0x80   : > { %v742_v29 = vadd.f32 %v741_v9, %v740_v53  ;;  %v753_v56 = vadd.f32 %v752_v25, %v751_v20  ;;  %v784_v33 = vadd.f32 %v783_v60, %v721_v13  ;;  %v805_v15 = vadd.f32 %v804_v37, %v730_v11 }
  0x81   : > { %v764_v43 = vadd.f32 %v763_v61, %v762_v2  ;;  %v775_v57 = vadd.f32 %v774_v42, %v773_v32  ;;  %v795_v14 = vadd.f32 %v794_v18, %v726_v23  ;;  %v815_v62 = vadd.f32 %v734_v40, %v733_v54 }
  0x82   : > { %v743_v1 = vrot.slane %v742_v29, 4  ;;  %v754_v46 = vrot.slane %v753_v56, 4  ;;  %v786_v4 = vadd.f32 %v785_v22, %v784_v33  ;;  %v806_v19 = vadd.f32 %v805_v15, %v731_v27 }
  0x83   : > { %v765_v0 = vrot.slane %v764_v43, 4  ;;  %v776_v47 = vrot.slane %v775_v57, 4  ;;  %v797_v5 = vadd.f32 %v796_v48, %v795_v14  ;;  %v816_v39 = vadd.f32 %v815_v62, %v735_v28 }
  0x84   : > { %v744_v63 = vadd.f32 %v743_v1, %v742_v29  ;;  %v755_v12 = vadd.f32 %v754_v46, %v753_v56  ;;  %v787_v16 = vrot.slane %v786_v4, 4  ;;  %v808_v51 = vadd.f32 %v807_v58, %v806_v19 }
  0x85   : > { %v766_v36 = vadd.f32 %v765_v0, %v764_v43  ;;  %v777_v52 = vadd.f32 %v776_v47, %v775_v57  ;;  %v798_v13 = vrot.slane %v797_v5, 4  ;;  %v817_v11 = vadd.f32 %v816_v39, %v736_v35 }
  0x86   : > { %v745_v3 = vrot.slane %v744_v63, 2  ;;  %v756_v34 = vrot.slane %v755_v12, 2  ;;  %v788_v23 = vadd.f32 %v787_v16, %v786_v4  ;;  %v809_v54 = vrot.slane %v808_v51, 4 }
  0x87   : > { %v767_v40 = vrot.slane %v766_v36, 2  ;;  %v778_v6 = vrot.slane %v777_v52, 2  ;;  %v799_v38 = vadd.f32 %v798_v13, %v797_v5  ;;  %v818_v27 = vsel %vm551_vm0, %v737_v24, 0.0 }
  0x88   : > { %v746_v9 = vadd.f32 %v745_v3, %v744_v63  ;;  %v757_v8 = vadd.f32 %v756_v34, %v755_v12  ;;  %v789_v28 = vrot.slane %v788_v23, 2  ;;  %v810_v25 = vadd.f32 %v809_v54, %v808_v51  ;;  %v897_v3 = vld [vmem:[%s1531_s25] sm:$0xff] (%p1116_p5) }
  0x89   : > { %v768_v26 = vadd.f32 %v767_v40, %v766_v36  ;;  %v779_v61 = vadd.f32 %v778_v6, %v777_v52  ;;  %v800_v42 = vrot.slane %v799_v38, 2  ;;  %v819_v21 = vadd.f32 %v818_v27, %v817_v11  ;;  %898 = vst [vmem:[%s867_s29] sm:$0xff] (%p1116_p5), %v897_v3 }
  0x8a   : > { %v747_v59 = vrot.slane %v746_v9, 1  ;;  %v758_v49 = vrot.slane %v757_v8, 1  ;;  %v790_v35 = vadd.f32 %v789_v28, %v788_v23  ;;  %v811_v22 = vrot.slane %v810_v25, 2 }
  0x8b   : > { %v769_v7 = vrot.slane %v768_v26, 1  ;;  %v780_v50 = vrot.slane %v779_v61, 1  ;;  %v801_v30 = vadd.f32 %v800_v42, %v799_v38  ;;  %v820_v48 = vrot.slane %v819_v21, 4 }
  0x8c   : > { %v748_v53 = vadd.f32 %v747_v59, %v746_v9  ;;  %v759_v20 = vadd.f32 %v758_v49, %v757_v8  ;;  %v791_v60 = vrot.slane %v790_v35, 1  ;;  %v812_v24 = vadd.f32 %v811_v22, %v810_v25 }
  0x8d   : > { %v770_v37 = vadd.f32 %v769_v7, %v768_v26  ;;  %v781_v2 = vadd.f32 %v780_v50, %v779_v61  ;;  %v802_v32 = vrot.slane %v801_v30, 1  ;;  %v821_v18 = vadd.f32 %v820_v48, %v819_v21 }
  0x8e   : > { %v792_v58 = vadd.f32 %v791_v60, %v790_v35  ;;  %v813_v29 = vrot.slane %v812_v24, 1  ;;  %v826_v56 = vadd.f32 %v748_v53, %v1448_v41  ;;  %v827_v33 = vadd.f32 %v759_v20, %v638_v31 }
  0x8f   : > { %v803_v15 = vadd.f32 %v802_v32, %v801_v30  ;;  %v822_v43 = vrot.slane %v821_v18, 2  ;;  %v828_v57 = vadd.f32 %v770_v37, %v639_v45  ;;  %v829_v14 = vadd.f32 %v781_v2, %v640_v44 }
  0x90   : > { %v814_v62 = vadd.f32 %v813_v29, %v812_v24  ;;  %v830_v1 = vadd.f32 %v792_v58, %v641_v10  ;;  %v842_v46 = vrot.slane %v827_v33, 7  ;;  %v1652_v36 = vrot.slane %v1448_v41, 7 }
  0x91   : > { %v823_v4 = vadd.f32 %v822_v43, %v821_v18  ;;  %v831_v19 = vadd.f32 %v803_v15, %v642_v17  ;;  %v844_v0 = vrot.slane %v828_v57, 6  ;;  %v846_v47 = vrot.slane %v829_v14, 5 }
  0x92   : > { %v832_v31 = vadd.f32 %v814_v62, %v643_v55  ;;  %v843_v45 = vsel %vm670_vm1, %v842_v46, %v826_v56  ;;  %v848_v5 = vrot.slane %v830_v1, 4 }
  0x93   : > { %v824_v39 = vrot.slane %v823_v4, 1  ;;  %v845_v44 = vsel %vm673_vm2, %v844_v0, %v843_v45  ;;  %v850_v63 = vrot.slane %v831_v19, 3 }
  0x94   : > { %v847_v10 = vsel %vm676_vm3, %v846_v47, %v845_v44  ;;  %v852_v12 = vrot.slane %v832_v31, 2 }
  0x95   : > { %v825_v16 = vadd.f32 %v824_v39, %v823_v4  ;;  %v849_v51 = vsel %vm679_vm4, %v848_v5, %v847_v10 }
  0x96   : > { %v851_v17 = vsel %vm682_vm5, %v850_v63, %v849_v51  ;;  %865 = sbr.rel (!%p1116_p5) target bundleno = 165 (0xa5), region = 112 }
  0x97   : > { %v833_v52 = vadd.f32 %v825_v16, %v1652_v36  ;;  %v853_v55 = vsel %vm685_vm6, %v852_v12, %v851_v17 }
  0x99   : > { %v854_v13 = vrot.slane %v833_v52, 1 }
  0x9b   : > { %v855_v11 = vsel %vm688_vm7, %v854_v13, %v853_v55 }
  0x9c   : > { %1004 = vst [vmem:[%s1531_s25 + $0x8] sm:$0xff] %v855_v11 }
  0xa3   : > { %v899_v34 = vld [vmem:[%s1531_s25 + $0x8] sm:$0xff] }
  0xa4   : > { %900 = vst [vmem:[%s867_s29 + $0x10] sm:$0xff] %v899_v34 }
  0xa5 PF: > { %p10_p11 = scmp.ge.s32.totalorder %s1100_s16, 4   ;;  %s1653_s12 = smov %s1055_s13 }
  0xa6   : > { %s1654_s13 = smov %s1110_s19  ;;  %s1655_s14 = smov %s1100_s16 }
  0xa7   :  { %12 = sbr.rel (!%p10_p11) target bundleno = 2 (0x2), region = 194 }

</bundles_post_ra>
